<compile_context>
chip_gen: v7x
topology: tpu7x:2x2x1
jax: 0.10.0
libtpu: 0.0.40
codegen_flags: <defaults>
</compile_context>

<pallas_src>
import numpy as np
import jax
import jax.numpy as jnp
from jax.experimental import pallas as pl
from jax.experimental.pallas import tpu as pltpu


def _round_up(x, m):
    return ((x + m - 1) // m) * m


def _vmem_capacity_bytes():
    try:
        return int(pltpu.get_tpu_info().vmem_capacity_bytes)
    except Exception:
        return 64 << 20  # conservative fallback: v7x per-TensorCore VMEM


def _sigmoid(s):
    # sigmoid(x) = (1 + tanh(x/2)) / 2 : one EUP push per vreg (vs exp + divide).
    return 0.5 * jnp.tanh(0.5 * s) + 0.5


# ----------------------- small-graph batched path (N <= 128) -----------------------

def _small_kernel(x_ref, out_ref):
    # x_ref: (Bb, N, D); out_ref: (Bb, N, N)
    xb = x_ref[...]
    s = jnp.einsum('bnd,bmd->bnm', xb, xb, preferred_element_type=jnp.float32)
    out_ref[...] = _sigmoid(s).astype(out_ref.dtype)


# ----------------------------- large-graph tiled path ------------------------------

def _tiled_kernel(xq_ref, xk_ref, out_ref):
    # xq_ref: (TI, D) row tile, xk_ref: (TJ, D) column tile, out_ref: (TI, TJ)
    s = jax.lax.dot_general(
        xq_ref[...], xk_ref[...],
        dimension_numbers=(((1,), (1,)), ((), ())),   # contract over D -> x @ x^T tile
        preferred_element_type=jnp.float32,
    )
    out_ref[...] = _sigmoid(s).astype(out_ref.dtype)


def _pick_tiles(N, D, in_esz, out_esz, budget_bytes):
    """Lane-long (ti, tj) output tiles whose double-buffered footprint fits the budget."""
    n_sub = _round_up(N, 8)      # sublane-legal cap for ti
    n_lane = _round_up(N, 128)   # lane-legal cap for tj
    for ti_c, tj_c in ((256, 1024), (256, 512), (128, 512), (128, 256),
                       (128, 128), (64, 128), (8, 128)):
        ti = min(ti_c, n_sub)
        tj = min(tj_c, n_lane)
        step = 2 * (ti * D + tj * D) * in_esz + 2 * ti * tj * out_esz
        if step <= budget_bytes:
            return ti, tj
    return 8, 128


def stru_decoder_forward(x, adj=None, *, out_dtype=None):
    """sigmoid(x @ x.transpose(0, 2, 1)).  `adj` is unused by the torch forward."""
    del adj
    B, N, D = x.shape
    out_dtype = x.dtype if out_dtype is None else jnp.dtype(out_dtype)
    in_esz = jnp.dtype(x.dtype).itemsize
    out_esz = jnp.dtype(out_dtype).itemsize

    vmem_cap = _vmem_capacity_bytes()
    # Clamp below physical VMEM with headroom for Mosaic internal scratch.
    vmem_hard_cap = min(max(32 << 20, vmem_cap - (12 << 20)), 100 << 20)

    cost = pl.CostEstimate(
        flops=2 * B * N * N * D,
        transcendentals=B * N * N,                          # 1 tanh per output element
        bytes_accessed=2 * B * N * D * in_esz + B * N * N * out_esz,
    )

    if N <= 128:
        # Batched path: many graphs per grid step, output block sized ~1-4 MiB.
        per_graph = N * D * in_esz + N * N * out_esz
        bb = int(max(1, min(B, (4 << 20) // max(1, 2 * per_graph))))
        grid = (pl.cdiv(B, bb),)
        step_bytes = 2 * bb * per_graph
        vmem_limit = int(min(max(step_bytes + (8 << 20), 32 << 20), vmem_hard_cap))
        return pl.pallas_call(
            _small_kernel,
            out_shape=jax.ShapeDtypeStruct((B, N, N), out_dtype),
            grid_spec=pltpu.PrefetchScalarGridSpec(
                num_scalar_prefetch=0,
                grid=grid,
                in_specs=[pl.BlockSpec((bb, N, D), lambda b: (b, 0, 0))],
                out_specs=pl.BlockSpec((bb, N, N), lambda b: (b, 0, 0)),
            ),
            compiler_params=pltpu.CompilerParams(
                dimension_semantics=("parallel",),
                vmem_limit_bytes=vmem_limit,
            ),
            cost_estimate=cost,
        )(x)

    # Tiled path: (batch*row-tile, col-tile) grid; ragged edges via cdiv + masked blocks.
    tile_budget = min(24 << 20, max(8 << 20, vmem_cap // 3))
    ti, tj = _pick_tiles(N, D, in_esz, out_esz, tile_budget)
    nti = pl.cdiv(N, ti)
    ntj = pl.cdiv(N, tj)
    grid = (B * nti, ntj)                      # long leading parallel axis (megacore)
    step_bytes = 2 * (ti * D + tj * D) * in_esz + 2 * ti * tj * out_esz
    vmem_limit = int(min(max(step_bytes + (8 << 20), 32 << 20), vmem_hard_cap))

    return pl.pallas_call(
        _tiled_kernel,
        out_shape=jax.ShapeDtypeStruct((B, N, N), out_dtype),
        grid_spec=pltpu.PrefetchScalarGridSpec(
            num_scalar_prefetch=0,
            grid=grid,
            in_specs=[
                pl.BlockSpec((None, ti, D), lambda bi, j: (bi // nti, bi % nti, 0)),
                pl.BlockSpec((None, tj, D), lambda bi, j: (bi // nti, j, 0)),
            ],
            out_specs=pl.BlockSpec((None, ti, tj),
                                   lambda bi, j: (bi // nti, bi % nti, j)),
        ),
        compiler_params=pltpu.CompilerParams(
            dimension_semantics=("parallel", "parallel"),
            vmem_limit_bytes=vmem_limit,
        ),
        cost_estimate=cost,
    )(x, x)


if __name__ == "__main__":
    # Small shapes consistent with the module: x = node embeddings (B, N, D),
    # adj = dense adjacency (B, N, N) (unused by this decoder's forward).
    B, N, D = 2, 16, 32
    key = jax.random.PRNGKey(0)
    kx, ka = jax.random.split(key)
    x = jax.random.normal(kx, (B, N, D), jnp.float32)
    adj = jax.random.uniform(ka, (B, N, N), jnp.float32)

    out = stru_decoder_forward(x, adj)
    jax.block_until_ready(out)

    # float64 numpy reference. Tolerance covers a possible bf16-pass MXU matmul
    # at default precision; real tiling/indexing bugs produce O(0.3+) errors.
    xf = np.asarray(x, dtype=np.float64)
    ref = 1.0 / (1.0 + np.exp(-np.einsum('bnd,bmd->bnm', xf, xf)))
    assert out.shape == (B, N, N) and out.dtype == x.dtype
    err = float(np.max(np.abs(np.asarray(out, dtype=np.float64) - ref)))
    assert err < 5e-2, err

    # Also exercise the tiled / ragged (N > 128, N % 128 != 0) path at a small size.
    B2, N2, D2 = 2, 160, 48
    x2 = jax.random.normal(jax.random.PRNGKey(1), (B2, N2, D2), jnp.float32)
    out2 = stru_decoder_forward(x2)
    jax.block_until_ready(out2)
    xf2 = np.asarray(x2, dtype=np.float64)
    ref2 = 1.0 / (1.0 + np.exp(-np.einsum('bnd,bmd->bnm', xf2, xf2)))
    assert out2.shape == (B2, N2, N2)
    err2 = float(np.max(np.abs(np.asarray(out2, dtype=np.float64) - ref2)))
    assert err2 < 5e-2, err2

    print("KERNEL_OK")
</pallas_src>

<mosaic_0001>
module attributes {stable_mosaic.version = 11 : i64} {
  func.func @_small_kernel(%arg0: i32, %arg1: memref<2x16x32xf32, #tpu.memory_space<vmem>>, %arg2: memref<2x16x16xf32, #tpu.memory_space<vmem>>) attributes {dimension_semantics = [#tpu.dimension_semantics<parallel>], iteration_bounds = array<i64: 1>, scalar_prefetch = 0 : i64, scratch_operands = 0 : i64, tpu.core_type = #tpu.core_type<tc>, window_params = [{transform_indices = @transform_0, window_bounds = array<i64: 2, 16, 32>}, {transform_indices = @transform_1, window_bounds = array<i64: 2, 16, 16>}]} {
    %c0 = arith.constant 0 : index
    %c0_0 = arith.constant 0 : index
    %c0_1 = arith.constant 0 : index
    %0 = vector.load %arg1[%c0, %c0_0, %c0_1] : memref<2x16x32xf32, #tpu.memory_space<vmem>>, vector<2x16x32xf32>
    "tpu.trace_start"() <{level = 10 : i32, message = "bnd,bmd->bnm"}> : () -> ()
    %cst = arith.constant dense<0.000000e+00> : vector<2x16x16xf32>
    %1 = tpu.matmul %0, %0, %cst {dimension_numbers = #tpu.dot_dimension_numbers<[2], [2], [1], [1], [0, 0, 0, 1, 1, 1], [0], [0]>} : vector<2x16x32xf32>, vector<2x16x32xf32>, vector<2x16x16xf32> -> vector<2x16x16xf32>
    "tpu.trace_stop"() : () -> ()
    %cst_2 = arith.constant 5.000000e-01 : f32
    %2 = vector.broadcast %cst_2 : f32 to vector<2x16x16xf32>
    %3 = arith.mulf %2, %1 : vector<2x16x16xf32>
    %4 = math.tanh %3 : vector<2x16x16xf32>
    %cst_3 = arith.constant 5.000000e-01 : f32
    %5 = vector.broadcast %cst_3 : f32 to vector<2x16x16xf32>
    %6 = arith.mulf %5, %4 : vector<2x16x16xf32>
    %cst_4 = arith.constant 5.000000e-01 : f32
    %7 = vector.broadcast %cst_4 : f32 to vector<2x16x16xf32>
    %8 = arith.addf %6, %7 : vector<2x16x16xf32>
    %c0_5 = arith.constant 0 : index
    %c0_6 = arith.constant 0 : index
    %c0_7 = arith.constant 0 : index
    %9 = vector.load %arg2[%c0_5, %c0_6, %c0_7] : memref<2x16x16xf32, #tpu.memory_space<vmem>>, vector<2x16x16xf32>
    tpu.vector_store %arg2[%c0_5, %c0_6, %c0_7], %8 {strides = array<i32>} : memref<2x16x16xf32, #tpu.memory_space<vmem>>, vector<2x16x16xf32>,
    return
  }
  func.func @transform_0(%arg0: i32) -> (i32, i32, i32) {
    %c0_i32 = arith.constant 0 : i32
    %c0_i32_0 = arith.constant 0 : i32
    %c0_i32_1 = arith.constant 0 : i32
    return %arg0, %c0_i32, %c0_i32_0 : i32, i32, i32
  }
  func.func @transform_1(%arg0: i32) -> (i32, i32, i32) {
    %c0_i32 = arith.constant 0 : i32
    %c0_i32_0 = arith.constant 0 : i32
    %c0_i32_1 = arith.constant 0 : i32
    return %arg0, %c0_i32, %c0_i32_0 : i32, i32, i32
  }
}

</mosaic_0001>

<bundles_post_ra>
// kernel: tpu_custom_call.1
= control target key start
LH: loop header
LB: loop body
LE: loop exit
PB: predicated region body
PF: predicated region fallthrough
CT: control target
= control target key end

     0   :  { %6 = vsyncpa [#allocation3], 0  ;;  %s374_s0 = inlined_call_operand.hbm [shape: f32[2,16,32], index: 0, kind: input, shape index: {}]   ;;  %s375_s1 = inlined_call_operand.hbm [shape: f32[2,16,16], index: 1, kind: output, shape index: {}]  }
   0x1   :  { %7 = vsyncpa [#allocation4], 0  ;;  %s330_s6 = smov [#allocation2]   ;;  %s282_s10 = scalar_lea.hbm %s374_s0, 512 }
   0x2   :  { %s13_s7 = sshll.u32 %s330_s6, 4  ;;  %p283_p0 = scmp.ne.s32.totalorder %s374_s0, %s282_s10  ;;  %s14_s7 = int_to_ptr.vmem [resolvable:$true] %s13_s7 }
   0x3   :  { %p286_p1 = scmp.lt.u32.totalorder %s282_s10, %s374_s0 }
   0x5   :  { %p288_p2 = pnand %p286_p1, %p283_p0 }
   0x7   :  { %291 = shalt.err (!%p288_p2)
}
   0x8   :  { %s292_s15 = scalar_lea.vmem %s14_s7, 512  ;;  %p297_p4 = scmp.lt.s32.totalorder %s14_s7, %s14_s7 }
   0x9   :  { %p293_p3 = scmp.ne.s32.totalorder %s14_s7, %s292_s15  ;;  %p298_p5 = scmp.lt.s32.totalorder %s292_s15, %s292_s15 }
   0xb   :  { %p299_p6 = por %p298_p5, %p297_p4 }
   0xd   :  { %p300_p7 = pnand %p299_p6, %p293_p3 }
   0xf   :  { %303 = shalt.err (!%p300_p7)
}
  0x10   :  { %s331_s16 = smov 128   ;;  %s332_s17 = smov 8  }
  0x11   :  { %19 = dma.hbm_to_vmem [thread:$0]  %s374_s0, 512, %s14_s7, [#allocation3], %s331_s16, %s331_s16, %s332_s17  }
  0x12   :  { %326 = dma.done.wait [#allocation3], 512  }
  0x13   :  { %327 = vsyncadd [#allocation3], 4294966784  ;;  %vm27_vm0 = vcmask 261120   ;;  %v23_v0 = vld [vmem:[#allocation2] sm:$0xff]  ;;  %v24_v1 = vld [vmem:[#allocation2 + $0x8] sm:$0xff]  ;;  %vm206_vm2 = vcmask 130048  }
  0x14   :  { %vm259_vm1 = vmpackc.low %vm27_vm0, %vm27_vm0  ;;  %v25_v2 = vld [vmem:[#allocation2 + $0x10] sm:$0xff]  ;;  %v258_v3 = vpack.c.bf16 %v24_v1, %v23_v0  ;;  %v26_v4 = vld [vmem:[#allocation2 + $0x18] sm:$0xff]  ;;  %248 = vmatprep.mubr.msk.f32.mxu0 %vm27_vm0, %v23_v0  ;;  %s333_s0 = smov [#allocation5]  }
  0x15   :  { %255 = vmatprep.mubr.msk.f32.mxu1 %vm27_vm0, %v25_v2  ;;  %v264_v5 = vpack.c.bf16 %v26_v4, %v25_v2  ;;  %s216_s20 = sshll.u32 %s333_s0, 4  ;;  %s217_s20 = int_to_ptr.vmem [resolvable:$true] %s216_s20 }
  0x16   :  { %260 = vmatprep.subr.msk.bf16.mxu0 %vm259_vm1, %v258_v3  ;;  %s304_s21 = scalar_lea.vmem %s217_s20, 512  ;;  %p309_p9 = scmp.lt.s32.totalorder %s217_s20, %s217_s20 }
  0x17   :  { %266 = vmatprep.subr.msk.bf16.mxu1 %vm259_vm1, %v264_v5  ;;  %263 = vmatpush3.bf16.xpose.msk.msra.mxu0 %vm259_vm1, %v258_v3  ;;  %p305_p8 = scmp.ne.s32.totalorder %s217_s20, %s304_s21  ;;  %p310_p10 = scmp.lt.s32.totalorder %s304_s21, %s304_s21 }
  0x18   :  { %269 = vmatpush3.bf16.xpose.msk.msra.mxu1 %vm259_vm1, %v264_v5 }
  0x19   :  { %p311_p11 = por %p310_p10, %p309_p9 }
  0x1b   :  { %p312_p12 = pnand %p311_p11, %p305_p8 }
  0x1e   :  { %249 = vmatmul.mubr.msk.f32.vlgmr.msra.gmra.mrb[0].mxu0 %vm27_vm0, %v24_v1 }
  0x1f   :  { %256 = vmatmul.mubr.msk.f32.vlgmr.msra.gmra.mrb[0].mxu1 %vm27_vm0, %v26_v4 }
  0xf1   :  { %v250_v6 = vpop.f32.mrb[0].mxu0 }
  0xf2   :  { %v191_v7 = vmul.f32 0.5, %v250_v6  ;;  %v257_v8 = vpop.f32.mrb[0].mxu1  ;;  %v100_v9 = vpop.f32.mrb[1].mxu0 }
  0xf3   :  { %v193_v10 = vmul.f32 0.5, %v257_v8  ;;  %v190_v11 = vmul.f32 0.5, %v100_v9  ;;  %v181_v12 = vpop.f32.mrb[1].mxu1 }
  0xf4   :  { %274 = vtanh.f32 %v191_v7  ;;  %v192_v13 = vmul.f32 0.5, %v181_v12 }
  0xf5   :  { %276 = vtanh.f32 %v193_v10 }
  0xf6   :  { %278 = vtanh.f32 %v190_v11 }
  0xf7   :  { %280 = vtanh.f32 %v192_v13 }
  0xfe   :  { %v275_v14 = vpop.eup %274 }
  0xff   :  { %v277_v15 = vpop.eup %276  ;;  %v199_v16 = vmul.f32 0.5, %v275_v14 }
 0x100   :  { %v279_v17 = vpop.eup %278  ;;  %v201_v18 = vmul.f32 0.5, %v277_v15 }
 0x101   :  { %v281_v19 = vpop.eup %280  ;;  %v203_v20 = vadd.f32 0.5, %v199_v16  ;;  %v198_v21 = vmul.f32 0.5, %v279_v17 }
 0x102   :  { %v205_v22 = vadd.f32 0.5, %v201_v18  ;;  %v200_v23 = vmul.f32 0.5, %v281_v19 }
 0x103   :  { %v202_v24 = vadd.f32 0.5, %v198_v21  ;;  %208 = vst.msk [vmem:[#allocation5 + $0x8] sm:$0xff] %vm206_vm2, %v203_v20 }
 0x104   :  { %210 = vst.msk [vmem:[#allocation5 + $0x18] sm:$0xff] %vm206_vm2, %v205_v22  ;;  %v204_v25 = vadd.f32 0.5, %v200_v23 }
 0x105   :  { %207 = vst.msk [vmem:[#allocation5] sm:$0xff] %vm206_vm2, %v202_v24 }
 0x106   :  { %209 = vst.msk [vmem:[#allocation5 + $0x10] sm:$0xff] %vm206_vm2, %v204_v25 }
 0x107   :  { %315 = shalt.err (!%p312_p12)
}
 0x108   :  { %s316_s24 = scalar_lea.hbm %s375_s1, 512 }
 0x109   :  { %p317_p13 = scmp.ne.s32.totalorder %s375_s1, %s316_s24  ;;  %p320_p0 = scmp.lt.u32.totalorder %s316_s24, %s375_s1 }
 0x10b   :  { %p322_p1 = pnand %p320_p0, %p317_p13 }
 0x10d   :  { %325 = shalt.err (!%p322_p1)
}
 0x10e   :  { %222 = dma.vmem_to_hbm [thread:$0]  %s217_s20, 512, %s375_s1, [#allocation4], %s331_s16, %s331_s16, %s332_s17  }
 0x10f   :  { %328 = dma.done.wait [#allocation4], 512  }
 0x110   :  { %329 = vsyncadd [#allocation4], 4294966784 }
 0x111   :  { %226 = vsyncpa [#allocation3], 1 }
 0x112   :  { %227 = vsyncpa [#allocation4], 1 }

</bundles_post_ra>
